<compile_context>
chip_gen: v7x
topology: tpu7x:2x2x1
jax: 0.10.0
libtpu: 0.0.40
codegen_flags: <defaults>
</compile_context>

<pallas_src>
import jax
import jax.numpy as jnp
from jax.experimental import pallas as pl
from jax.experimental.pallas import tpu as pltpu


def _round_up(v, m):
    return ((v + m - 1) // m) * m


def _vmem_capacity_bytes():
    try:
        return int(pltpu.get_tpu_info().vmem_capacity_bytes)
    except Exception:
        return 128 * 1024 * 1024  # v5e / v6e default


def triangle_kernel(x_ref, t_ref, o_ref):
    # x_ref: (TN, 2); t_ref: (1, TD); o_ref: (TN, TD)
    x0 = x_ref[:, 0:1].astype(jnp.float32)        # (TN, 1)
    x1 = x_ref[:, 1:2].astype(jnp.float32)        # (TN, 1)
    t = t_ref[...].astype(jnp.float32)            # (1, TD)
    val = x1 - jnp.abs(t - x0)                    # broadcast -> (TN, TD), all in f32
    o_ref[...] = jnp.maximum(val, 0.0).astype(o_ref.dtype)


def triangle_transform(x, t_param, *, out_dtype=None):
    """relu(x[:,1,None] - |t_param - x[:,0,None]|) -> [N, D] (exact shape, no padding)."""
    N = x.shape[0]
    D = t_param.shape[0]
    out_dtype = x.dtype if out_dtype is None else out_dtype
    out_itemsize = jnp.dtype(out_dtype).itemsize
    x_itemsize = jnp.dtype(x.dtype).itemsize

    # --- generation-aware VMEM budget ------------------------------------------------
    vmem_cap = _vmem_capacity_bytes()
    if vmem_cap <= 64 * 1024 * 1024:              # v7x-class: 64 MiB per TensorCore
        vmem_limit = 40 * 1024 * 1024
        out_buf_target = 6 * 1024 * 1024          # per output buffer (double-buffered)
    else:                                          # v5e / v6e: 128 MiB
        vmem_limit = 48 * 1024 * 1024
        out_buf_target = 8 * 1024 * 1024

    # --- D tiling: full-D fast path; lane-dense 2048-wide tiles only for very wide D --
    Dp = _round_up(D, 128)                         # lane-padded width, for budgeting only
    if Dp * 256 * out_itemsize <= out_buf_target:  # >=256 rows per tile still possible
        tile_d, tile_d_pad = D, Dp                 # single D block (fast path)
    else:
        tile_d = tile_d_pad = 2048                 # multiple of 128; ragged tail masked

    # --- tile_n from output bytes, accounting for input lane padding ------------------
    tile_n = out_buf_target // (tile_d_pad * out_itemsize)
    # Fit: 2x output buffer + 2x lane-padded (tile_n, 2)->(tile_n, 128) x buffer + t buffer.
    t_bytes = 2 * 8 * tile_d_pad * 4
    per_row = 2 * (tile_d_pad * out_itemsize + 128 * x_itemsize)
    avail = int(0.75 * vmem_limit) - t_bytes
    tile_n = min(tile_n, max(8, avail // per_row))
    tile_n = min(tile_n, _round_up(N, 8))          # never bigger than the problem
    if N > 8:
        # At least 2 row blocks so both TensorCores of a dual-TC chip get work.
        tile_n = min(tile_n, _round_up(pl.cdiv(N, 2), 8))
    tile_n = max(8, (tile_n // 8) * 8)

    grid = (pl.cdiv(N, tile_n), pl.cdiv(D, tile_d))

    t2d = t_param.reshape(1, D)

    cost = pl.CostEstimate(
        flops=4 * N * D,
        transcendentals=0,
        bytes_accessed=N * D * out_itemsize + N * 2 * x_itemsize + D * t_param.dtype.itemsize,
    )

    out = pl.pallas_call(
        triangle_kernel,
        out_shape=jax.ShapeDtypeStruct((N, D), out_dtype),
        grid=grid,
        in_specs=[
            pl.BlockSpec((tile_n, 2), lambda i, j: (i, 0)),     # x rows for this row tile
            pl.BlockSpec((1, tile_d), lambda i, j: (0, j)),     # t lanes for this D tile
        ],
        out_specs=pl.BlockSpec((tile_n, tile_d), lambda i, j: (i, j)),
        compiler_params=pltpu.CompilerParams(
            dimension_semantics=("parallel", "parallel"),
            vmem_limit_bytes=vmem_limit,
        ),
        cost_estimate=cost,
    )(x, t2d)

    return out


if __name__ == "__main__":
    key = jax.random.PRNGKey(0)
    k_x, k_t, k_x2, k_t2 = jax.random.split(key, 4)

    # Case 1: small shapes consistent with the module (N points, output_dim t-params).
    N, output_dim = 16, 64
    x = jax.random.normal(k_x, (N, 2), dtype=jnp.float32)
    t_param = jax.random.normal(k_t, (output_dim,), dtype=jnp.float32) * 0.1

    out = jax.block_until_ready(triangle_transform(x, t_param))
    ref = jnp.maximum(x[:, 1][:, None] - jnp.abs(t_param - x[:, 0][:, None]), 0.0)
    assert out.shape == (N, output_dim)
    assert jnp.allclose(out, ref, atol=1e-6), "mismatch vs reference (case 1)"

    # Case 2: non-multiple N and D to exercise the exact-output ragged-block path.
    N2, D2 = 40, 200
    x2 = jax.random.normal(k_x2, (N2, 2), dtype=jnp.float32)
    t2 = jax.random.normal(k_t2, (D2,), dtype=jnp.float32) * 0.1

    out2 = jax.block_until_ready(triangle_transform(x2, t2))
    ref2 = jnp.maximum(x2[:, 1][:, None] - jnp.abs(t2 - x2[:, 0][:, None]), 0.0)
    assert out2.shape == (N2, D2)
    assert jnp.allclose(out2, ref2, atol=1e-6), "mismatch vs reference (case 2)"

    print("KERNEL_OK")
</pallas_src>

<mosaic_0001>
module attributes {stable_mosaic.version = 11 : i64} {
  func.func @triangle_kernel(%arg0: i32, %arg1: i32, %arg2: memref<8x2xf32, #tpu.memory_space<vmem>>, %arg3: memref<1x64xf32, #tpu.memory_space<vmem>>, %arg4: memref<8x64xf32, #tpu.memory_space<vmem>>) attributes {dimension_semantics = [#tpu.dimension_semantics<parallel>, #tpu.dimension_semantics<parallel>], iteration_bounds = array<i64: 2, 1>, scalar_prefetch = 0 : i64, scratch_operands = 0 : i64, tpu.core_type = #tpu.core_type<tc>, window_params = [{transform_indices = @transform_0, window_bounds = array<i64: 8, 2>}, {transform_indices = @transform_1, window_bounds = array<i64: 1, 64>}, {transform_indices = @transform_2, window_bounds = array<i64: 8, 64>}]} {
    %c0 = arith.constant 0 : index
    %c0_0 = arith.constant 0 : index
    %0 = vector.load %arg2[%c0, %c0_0] : memref<8x2xf32, #tpu.memory_space<vmem>>, vector<8x1xf32>
    %c0_1 = arith.constant 0 : index
    %c1 = arith.constant 1 : index
    %1 = vector.load %arg2[%c0_1, %c1] : memref<8x2xf32, #tpu.memory_space<vmem>>, vector<8x1xf32>
    %c0_2 = arith.constant 0 : index
    %c0_3 = arith.constant 0 : index
    %2 = vector.load %arg3[%c0_2, %c0_3] : memref<1x64xf32, #tpu.memory_space<vmem>>, vector<1x64xf32>
    %3 = vector.broadcast %2 : vector<1x64xf32> to vector<8x64xf32>
    %4 = vector.broadcast %0 : vector<8x1xf32> to vector<8x64xf32>
    %5 = arith.subf %3, %4 : vector<8x64xf32>
    %6 = math.absf %5 : vector<8x64xf32>
    %7 = vector.broadcast %1 : vector<8x1xf32> to vector<8x64xf32>
    %8 = arith.subf %7, %6 : vector<8x64xf32>
    %cst = arith.constant 0.000000e+00 : f32
    %9 = vector.broadcast %cst : f32 to vector<8x64xf32>
    %10 = arith.maximumf %8, %9 : vector<8x64xf32>
    %c0_4 = arith.constant 0 : index
    %c0_5 = arith.constant 0 : index
    %11 = vector.load %arg4[%c0_4, %c0_5] : memref<8x64xf32, #tpu.memory_space<vmem>>, vector<8x64xf32>
    tpu.vector_store %arg4[%c0_4, %c0_5], %10 {strides = array<i32>} : memref<8x64xf32, #tpu.memory_space<vmem>>, vector<8x64xf32>,
    return
  }
  func.func @transform_0(%arg0: i32, %arg1: i32) -> (i32, i32) {
    %c0_i32 = arith.constant 0 : i32
    %c0_i32_0 = arith.constant 0 : i32
    return %arg0, %c0_i32 : i32, i32
  }
  func.func @transform_1(%arg0: i32, %arg1: i32) -> (i32, i32) {
    %c0_i32 = arith.constant 0 : i32
    %c0_i32_0 = arith.constant 0 : i32
    return %c0_i32, %arg1 : i32, i32
  }
  func.func @transform_2(%arg0: i32, %arg1: i32) -> (i32, i32) {
    %c0_i32 = arith.constant 0 : i32
    return %arg0, %arg1 : i32, i32
  }
}

</mosaic_0001>

<bundles_post_ra>
// kernel: tpu_custom_call.1
= control target key start
LH: loop header
LB: loop body
LE: loop exit
PB: predicated region body
PF: predicated region fallthrough
CT: control target
= control target key end

     0   :  { %7 = vsyncpa [#allocation3], 0  ;;  %s570_s0 = inlined_call_operand.vmem [shape: f32[16,2], index: 0, kind: input, shape index: {}]   ;;  %s571_s1 = inlined_call_operand.vmem [shape: f32[1,64], index: 1, kind: input, shape index: {}]   ;;  %s572_s2 = inlined_call_operand.hbm [shape: f32[16,64], index: 2, kind: output, shape index: {}]  }
   0x1   :  { %9 = vsyncpa [#allocation3 + $0x1], 0  ;;  %s455_s9 = smov 0   ;;  %s457_s10 = smov 0  }
   0x2   :  { %s459_s11 = smov 0   ;;  %s461_s12 = smov 0  }
   0x3   :  { %s463_s13 = smov 0   ;;  %s465_s14 = smov 0  }
   0x4 LB: > { %s285_s15 = sadd.s32 4294967295, %s435_s14   ;;  %s286_s16 = sadd.s32 4294967294, %s435_s14   ;;  %s435_s14 = sphi %s465_s14, %s15_s14   ;;  %s431_s13 = sphi %s463_s13, %s579_s13   ;;  %s427_s12 = sphi %s461_s12, %s578_s12   ;;  %s423_s11 = sphi %s459_s11, %s577_s11   ;;  %s419_s10 = sphi %s457_s10, %s576_s10   ;;  %s415_s9 = sphi %s455_s9, %s575_s9  }
   0x5   : > { %s27_s17 = sadd.s32 1, %s431_s13  ;;  %s88_s18 = sadd.s32 1, %s423_s11 }
   0x6   : > { %p29_p0 = scmp.ge.s32.totalorder %s27_s17, 2  ;;  %p98_p1 = scmp.ne.s32.totalorder %s423_s11, %s419_s10 }
   0x7   : > { %p99_p2 = scmp.eq.s32.totalorder %s285_s15, 1  ;;  %p104_p3 = scmp.ne.s32.totalorder %s419_s10, %s415_s9 }
   0x8   : > { %s581_s17 = smov (%p29_p0, %s27_s17), 0  ;;  %p105_p5 = scmp.eq.s32.totalorder %s286_s16, 1 }
   0x9   : > { %p495_p4 = por %p99_p2, %p98_p1  ;;  %s83_s20 = ssub.s32 %s431_s13, %s581_s17 }
   0xa   : > { %p290_p6 = scmp.ge.s32.totalorder %s435_s14, 1  ;;  %p86_p7 = scmp.eq.s32.totalorder %s83_s20, 0 }
   0xb   : > { %p502_p8 = por %p105_p5, %p104_p3  ;;  %p136_p9 = scmp.lt.s32.totalorder %s435_s14, 3 }
   0xc   : > { %s508_s22 = scalar_select %p86_p7, %s423_s11, %s88_s18  }
   0xd   : > { %p137_p10 = pnand %p290_p6, %p136_p9 }
   0xe   : > { %p160_p11 = scmp.lt.s32.totalorder (!%p137_p10), %s427_s12, 1  ;;  %v437_v0 = vmov (!%p137_p10), 0   ;;  %v438_v2 = vmov (!%p137_p10), 1   ;;  %s157_s28 = sand.u32 (!%p137_p10), 1, %s419_s10   ;;  %v293_v3 = vld [vmem:[%s571_s1] ss:$0 sm:$0xff] (!%p137_p10) }
   0xf   : > { %140 = sbr.rel (%p137_p10) target bundleno = 178 (0xb2), region = 28  ;;  %355 = vset.pattern.permute.xlu0 (!%p137_p10), %v437_v0  ;;  %s291_s3 = sshll.u32 (!%p137_p10), %s157_s28, 3  ;;  %vm188_vm0 = vcmask (!%p137_p10), 523264  }
  0x10   : > { %s295_s4 = sshll.u32 (!%p137_p10), %s427_s12, 7  ;;  %s159_s5 = scalar_lea.vmem (!%p137_p10), [#allocation2], %s291_s3 }
  0x11   : > { %s205_s6 = sshll.u32 (!%p137_p10), %s159_s5, 4  ;;  %s523_s15 = scalar_lea.hbm (!%p137_p10), %s572_s2, %s295_s4  ;;  %s525_s6 = int_to_ptr.vmem [resolvable:$true] %s205_s6 }
  0x12   : > { %s191_s16 = scalar_lea.sflag (!%p137_p10), [#allocation3], %s157_s28  ;;  %s357_s18 = scalar_lea.vmem (!%p137_p10), %s525_s6, 128 }
  0x13   : > { %p358_p12 = scmp.ne.s32.totalorder (!%p137_p10), %s525_s6, %s357_s18 }
  0x15   : > { %p359_p13 = pnand (!%p137_p10), %p358_p12, %p495_p4 }
  0x16   : > { %s161_s23 = scalar_select %p160_p11, %s427_s12, 1 }
  0x17   : > { %p360_p0 = pneg %p359_p13  ;;  %s439_s12 = smov [#allocation2]  }
  0x18   : > { %s292_s24 = sshll.u32 %s161_s23, 3  ;;  %s361_s20 = sshll.u32 %s439_s12, 4  ;;  %s362_s20 = int_to_ptr.vmem [resolvable:$false] %s361_s20 }
  0x19   : > { %s163_s27 = scalar_lea.vmem %s570_s0, %s292_s24  ;;  %s363_s23 = scalar_lea.vmem %s362_s20, 256 }
  0x1a   : > { %v167_v1 = vld [vmem:[%s163_s27] sm:$0xff]  ;;  %p364_p1 = scmp.lt.s32.totalorder %s525_s6, %s362_s20  ;;  %p365_p2 = scmp.lt.s32.totalorder %s363_s23, %s357_s18 }
  0x1b   : > { %177 = vperm.xlu0 %355, %v167_v1  }
  0x1c   : > { %p366_p3 = por %p365_p2, %p364_p1 }
  0x1e   : > { %p367_p5 = pnand %p366_p3, %p360_p0 }
  0x1f   : > { %356 = vset.pattern.permute.xlu0 %v438_v2 }
  0x20   : > { %183 = vperm.xlu0 %356, %v167_v1  }
  0x9a   : > { %v178_v4 = vpop.permute.xlu0 %177 }
  0x9b   : > { %v180_v5 = vsub.f32 %v293_v3, %v178_v4 }
  0x9d   : > { %v181_v6 = vand.u32 2147483647, %v180_v5 }
  0x9f   : > { %v184_v7 = vpop.permute.xlu0 %183 }
  0xa0   : > { %v186_v8 = vsub.f32 %v184_v7, %v181_v6 }
  0xa2   : > { %v187_v9 = vmax.f32 %v186_v8, 0.0 }
  0xa4   : > { %189 = vst.msk [vmem:[%s159_s5] sm:$0xff] %vm188_vm0, %v187_v9 }
  0xa5   : > { %370 = shalt.err (!%p367_p5)
}
  0xa6   : > { %s371_s24 = scalar_lea.hbm %s523_s15, 128  ;;  %s375_s27 = scalar_lea.hbm %s572_s2, 256 }
  0xa7   : > { %p372_p6 = scmp.ne.s32.totalorder %s523_s15, %s371_s24  ;;  %p376_p10 = scmp.lt.u32.totalorder %s523_s15, %s572_s2 }
  0xa8   : > { %p377_p11 = scmp.lt.u32.totalorder %s375_s27, %s371_s24  ;;  %p379_p13 = scmp.lt.u32.totalorder %s371_s24, %s523_s15 }
  0xa9   : > { %p373_p7 = pnand %p372_p6, %p495_p4 }
  0xaa   : > { %p378_p12 = por %p377_p11, %p376_p10 }
  0xab   : > { %p374_p9 = pneg %p373_p7 }
  0xac   : > { %p380_p0 = por %p379_p13, %p378_p12 }
  0xae   : > { %p381_p1 = pnand %p380_p0, %p374_p9 }
  0xb0   : > { %384 = shalt.err (!%p381_p1)
}
  0xb1   : > { %298 = dma.vmem_to_hbm [thread:$0]  (%p495_p4), %s525_s6, 128, %s523_s15, %s191_s16  }
  0xb2 PF: > { %p304_p2 = scmp.ge.s32.totalorder %s435_s14, 2  ;;  %s217_s30 = sand.u32 1, %s415_s9  }
  0xb3   : > { %s218_s3 = scalar_lea.sflag [#allocation3], %s217_s30 }
  0xb4   : > { %p301_p3 = pnand %p304_p2, %p502_p8 }
  0xb6   : > { %410 = dma.done.wait (!%p301_p3), %s218_s3, 128  }
  0xb7   : > { %412 = vsyncadd (!%p301_p3), %s218_s3, 4294967168  ;;  %s15_s14 = sadd.s32 1, %s435_s14   ;;  %s575_s9 = smov %s419_s10 }
  0xb8   : > { %p12_p5 = scmp.ge.s32.totalorder %s15_s14, 4   ;;  %s576_s10 = smov %s423_s11 }
  0xb9   : > { %s577_s11 = smov %s508_s22  ;;  %s578_s12 = smov %s431_s13 }
  0xba   : > { %s579_s13 = smov %s581_s17  ;;  %14 = sbr.rel (!%p12_p5) target bundleno = 4 (0x4), region = 66 }
  0xc1   :  { %223 = vsyncpa [#allocation3], 1 }
  0xc2   :  { %225 = vsyncpa [#allocation3 + $0x1], 1 }

</bundles_post_ra>
